<compile_context>
chip_gen: v7x
topology: tpu7x:2x2x1
jax: 0.10.0
libtpu: 0.0.40
codegen_flags: <defaults>
</compile_context>

<pallas_src>
import functools
import math

import jax
import jax.numpy as jnp
from jax import lax
from jax.experimental import pallas as pl
from jax.experimental.pallas import tpu as pltpu


def _round_up(x: int, m: int) -> int:
    return m * math.ceil(x / m)


# ---------------------------------------------------------------------------
# Primary kernel: table resident in VMEM, one-hot matmul gather on the MXU.
# ---------------------------------------------------------------------------
def _one_hot_matmul_kernel(labels_ref, table_ref, out_ref):
    """out[b, :] = table[labels[b], :] as a one-hot MXU matmul.

    labels_ref: VMEM (TB, 1) int32 block of effective labels
    table_ref:  VMEM (V_pad, H_pad) padded table, resident across grid steps
    out_ref:    VMEM (TB, H_pad) output block
    """
    tb = out_ref.shape[0]
    v_pad = table_ref.shape[0]
    lbl = labels_ref[...]                                       # (TB, 1)
    col = lax.broadcasted_iota(jnp.int32, (tb, v_pad), 1)       # (TB, V_pad)
    one_hot = (col == lbl).astype(table_ref.dtype)              # exact 0 / 1
    out_ref[...] = jnp.dot(
        one_hot, table_ref[...], preferred_element_type=jnp.float32
    ).astype(out_ref.dtype)


# ---------------------------------------------------------------------------
# Fallback kernel (very large tables): HBM row gather with a DMA sem ring.
# ---------------------------------------------------------------------------
def _hbm_row_gather_kernel(labels_ref, table_hbm, out_ref, sems, *,
                           rows_per_tile, n_sems):
    """Gather `rows_per_tile` rows straight from the HBM table.

    labels_ref: SMEM (B_pad,) int32 effective labels (scalar prefetch)
    table_hbm:  HBM  (V_pad, H_pad) table (never copied whole)
    out_ref:    VMEM (rows_per_tile, H_pad) output block
    sems:       DMA semaphore ring (n_sems slots, n_sems copies in flight)
    """
    base = pl.program_id(0) * rows_per_tile

    def row_copy(r, slot):
        lbl = labels_ref[base + r]
        return pltpu.make_async_copy(
            table_hbm.at[pl.ds(lbl, 1), :],
            out_ref.at[pl.ds(r, 1), :],
            sems.at[slot],
        )

    # Prime up to n_sems row copies (small static unroll; they overlap in HBM).
    for r in range(min(n_sems, rows_per_tile)):
        row_copy(r, r).start()

    def body(r, carry):
        slot = r % n_sems
        # Wait with the *same* src/dst slices that were issued for row r.
        row_copy(r, slot).wait()

        @pl.when(r + n_sems < rows_per_tile)
        def _():
            row_copy(r + n_sems, slot).start()

        return carry

    lax.fori_loop(0, rows_per_tile, body, 0)


class ParallelLabelEmbedder:
    """JAX/Pallas port of the PyTorch ParallelLabelEmbedder.

    # TODO(synk): ParallelEmbedding's vocab/model-parallel sharding and the
    # dist.broadcast of drop_ids across the model-parallel group have no
    # single-device equivalent here; a replicated table and local RNG are used.
    """

    def __init__(self, num_classes: int, hidden_size: int, dropout_prob: float,
                 key: jax.Array, dtype=jnp.float32, max_rows_per_tile: int = 256,
                 vmem_budget_bytes: int = 24 << 20):
        use_cfg_embedding = int(dropout_prob > 0)
        v = num_classes + use_cfg_embedding

        self.num_classes = num_classes
        self.hidden_size = hidden_size
        self.dropout_prob = dropout_prob
        self.dtype = dtype

        itemsize = jnp.dtype(dtype).itemsize
        self._row_align = {4: 8, 2: 16, 1: 32}.get(itemsize, 8)
        self._h_pad = _round_up(hidden_size, 128)    # lane-dense rows / stores
        self._v_pad = _round_up(v, 128)              # aligned MXU contraction
        self._max_tile = max_rows_per_tile
        self._vmem_budget = vmem_budget_bytes

        # ParallelEmbedding init: normal_(std=0.02), shape (V, H).
        tbl = (0.02 * jax.random.normal(key, (v, hidden_size),
                                        dtype=jnp.float32)).astype(dtype)
        self.embedding_table = tbl                   # logical (V, H) table
        # Zero-padded copy actually used by the kernels.
        self._table_padded = (jnp.zeros((self._v_pad, self._h_pad), dtype)
                              .at[:v, :hidden_size].set(tbl))

    # ----- tiling ----------------------------------------------------------
    def _pick_tile(self, b: int) -> int:
        ra = self._row_align
        b_al = _round_up(b, ra)
        if b_al <= ra:
            return b_al
        # Aim for >= 2 grid steps so ("parallel",) can shard across the two
        # v7x TensorCores; cap the tile so double-buffered blocks stay small.
        half = _round_up(-(-b_al // 2), ra)
        return min(self._max_tile, half)

    # ----- Pallas gather ---------------------------------------------------
    def _embed(self, eff_labels: jax.Array) -> jax.Array:
        b = eff_labels.shape[0]
        tb = self._pick_tile(b)
        b_pad = _round_up(b, tb)

        eff_labels = eff_labels.astype(jnp.int32)
        if b_pad != b:
            # Padded tail labels read row 0 of the table; those rows are
            # sliced off below.  (Do NOT pad with num_classes: when
            # dropout_prob == 0 there is no CFG row and that would be OOB.)
            eff_labels = jnp.concatenate(
                [eff_labels, jnp.zeros((b_pad - b,), jnp.int32)])

        itemsize = jnp.dtype(self.dtype).itemsize
        table_bytes = self._v_pad * self._h_pad * itemsize
        matmul_vmem = (table_bytes                        # resident table
                       + 2 * tb * self._h_pad * itemsize  # dbl-buffered out
                       + 2 * tb * 4                       # dbl-buffered labels
                       + (4 << 20))                       # scratch slack

        if matmul_vmem <= self._vmem_budget:
            out = self._embed_matmul(eff_labels, b_pad, tb, matmul_vmem)
        else:
            out = self._embed_hbm_gather(eff_labels, b_pad, tb)

        return out[:b, :self.hidden_size]

    def _embed_matmul(self, labels, b_pad, tb, vmem_bytes):
        v_pad, h_pad = self._v_pad, self._h_pad
        labels_2d = labels.reshape(b_pad, 1)

        return pl.pallas_call(
            _one_hot_matmul_kernel,
            out_shape=jax.ShapeDtypeStruct((b_pad, h_pad), self.dtype),
            grid_spec=pltpu.PrefetchScalarGridSpec(
                num_scalar_prefetch=0,
                grid=(b_pad // tb,),
                in_specs=[
                    pl.BlockSpec((tb, 1), lambda i: (i, 0)),          # labels
                    pl.BlockSpec((v_pad, h_pad), lambda i: (0, 0)),   # table
                ],
                out_specs=pl.BlockSpec((tb, h_pad), lambda i: (i, 0)),
            ),
            compiler_params=pltpu.CompilerParams(
                dimension_semantics=("parallel",),
                vmem_limit_bytes=int(vmem_bytes)),
        )(labels_2d, self._table_padded)

    def _embed_hbm_gather(self, labels, b_pad, tb):
        h_pad = self._h_pad
        n_sems = 8  # tb is always a multiple of row_align >= 8
        itemsize = jnp.dtype(self.dtype).itemsize
        vmem_bytes = 2 * tb * h_pad * itemsize + (4 << 20)

        kernel = functools.partial(_hbm_row_gather_kernel,
                                   rows_per_tile=tb, n_sems=n_sems)

        return pl.pallas_call(
            kernel,
            out_shape=jax.ShapeDtypeStruct((b_pad, h_pad), self.dtype),
            grid_spec=pltpu.PrefetchScalarGridSpec(
                num_scalar_prefetch=1,                      # labels -> SMEM
                grid=(b_pad // tb,),
                in_specs=[pl.BlockSpec(memory_space=pl.ANY)],   # table in HBM
                out_specs=pl.BlockSpec((tb, h_pad), lambda t, lbl: (t, 0)),
                scratch_shapes=[pltpu.SemaphoreType.DMA((n_sems,))],
            ),
            compiler_params=pltpu.CompilerParams(
                dimension_semantics=("parallel",),
                vmem_limit_bytes=int(vmem_bytes)),
        )(labels, self._table_padded)

    # ----- Module forward --------------------------------------------------
    def __call__(self, labels, train: bool, force_drop_ids=None, rng=None):
        labels = labels.astype(jnp.int32)
        use_dropout = self.dropout_prob > 0
        apply_drop = (train and use_dropout) or (force_drop_ids is not None)

        if force_drop_ids is not None and not use_dropout:
            # No CFG row allocated; indexing row `num_classes` would be OOB
            # (silently wrong on TPU: HBM/VMEM reads are unchecked).
            raise ValueError(
                "force_drop_ids requires dropout_prob > 0 (CFG row present).")

        if apply_drop:
            if force_drop_ids is not None:
                drop_ids = force_drop_ids == 1
            else:
                if rng is None:
                    raise ValueError(
                        "rng key required for stochastic label dropout.")
                # torch.rand(B) < dropout_prob
                # TODO(synk): dist.broadcast of drop_ids across the
                # model-parallel group has no single-device equivalent here;
                # single device / replicated RNG assumed.
                drop_ids = jax.random.uniform(
                    rng, (labels.shape[0],)) < self.dropout_prob
            labels = jnp.where(drop_ids, self.num_classes, labels)

        # (Optional further win per review: dedupe labels here for CFG-heavy
        # batches before embedding; skipped to keep the wrapper static-shaped.)
        return self._embed(labels)


if __name__ == "__main__":
    num_classes = 10
    hidden_size = 32
    dropout_prob = 0.1
    batch = 8

    root = jax.random.PRNGKey(0)
    k_table, k_labels, k_drop = jax.random.split(root, 3)

    embedder = ParallelLabelEmbedder(num_classes, hidden_size, dropout_prob,
                                     key=k_table)
    labels = jax.random.randint(k_labels, (batch,), 0, num_classes,
                                dtype=jnp.int32)

    # eval path (no drop) -- row lookup via the VMEM one-hot matmul path
    out_eval = jax.block_until_ready(embedder(labels, train=False))
    ref_eval = embedder.embedding_table[labels]
    assert out_eval.shape == (batch, hidden_size)
    assert jnp.allclose(out_eval, ref_eval, atol=1e-5, rtol=1e-4)

    # training path (stochastic CFG token-drop, deterministic key)
    out_train = jax.block_until_ready(embedder(labels, train=True, rng=k_drop))
    assert out_train.shape == (batch, hidden_size)

    # forced-drop path
    force = jnp.array([1, 0] * (batch // 2), dtype=jnp.int32)
    out_forced = jax.block_until_ready(
        embedder(labels, train=False, force_drop_ids=force))
    ref_forced = embedder.embedding_table[
        jnp.where(force == 1, num_classes, labels)]
    assert jnp.allclose(out_forced, ref_forced, atol=1e-5, rtol=1e-4)

    # non-multiple-of-tile batch (exercises the row-padding path)
    out_odd = jax.block_until_ready(embedder(labels[:5], train=False))
    assert jnp.allclose(out_odd, embedder.embedding_table[labels[:5]],
                        atol=1e-5, rtol=1e-4)

    # very-large-table fallback: force the HBM row-gather + sem-ring path
    embedder_big = ParallelLabelEmbedder(num_classes, hidden_size, dropout_prob,
                                         key=k_table, vmem_budget_bytes=0)
    out_gather = jax.block_until_ready(embedder_big(labels, train=False))
    assert jnp.allclose(out_gather, embedder_big.embedding_table[labels],
                        atol=1e-5, rtol=1e-4)

    print("KERNEL_OK")
</pallas_src>

<mosaic_0001>
module attributes {stable_mosaic.version = 11 : i64} {
  func.func @_one_hot_matmul_kernel(%arg0: i32, %arg1: memref<8x1xi32, #tpu.memory_space<vmem>>, %arg2: memref<128x128xf32, #tpu.memory_space<vmem>>, %arg3: memref<8x128xf32, #tpu.memory_space<vmem>>) attributes {dimension_semantics = [#tpu.dimension_semantics<parallel>], iteration_bounds = array<i64: 1>, scalar_prefetch = 0 : i64, scratch_operands = 0 : i64, tpu.core_type = #tpu.core_type<tc>, window_params = [{transform_indices = @transform_0, window_bounds = array<i64: 8, 1>}, {pipeline_mode = #tpu.pipeline_mode<synchronous>, transform_indices = @transform_1, window_bounds = array<i64: 128, 128>}, {transform_indices = @transform_2, window_bounds = array<i64: 8, 128>}]} {
    %c0 = arith.constant 0 : index
    %c0_0 = arith.constant 0 : index
    %0 = vector.load %arg1[%c0, %c0_0] : memref<8x1xi32, #tpu.memory_space<vmem>>, vector<8x1xi32>
    %1 = tpu.iota {dimensions = array<i32: 1>} : vector<8x128xi32>
    %2 = vector.broadcast %0 : vector<8x1xi32> to vector<8x128xi32>
    %3 = arith.cmpi eq, %1, %2 : vector<8x128xi32>
    %4 = arith.extui %3 : vector<8x128xi1> to vector<8x128xi32>
    %5 = arith.sitofp %4 : vector<8x128xi32> to vector<8x128xf32>
    %c0_1 = arith.constant 0 : index
    %c0_2 = arith.constant 0 : index
    %6 = vector.load %arg2[%c0_1, %c0_2] : memref<128x128xf32, #tpu.memory_space<vmem>>, vector<128x128xf32>
    %cst = arith.constant dense<0.000000e+00> : vector<8x128xf32>
    %7 = tpu.matmul %5, %6, %cst {dimension_numbers = #tpu.dot_dimension_numbers<[1], [0], [0], [1], [0, 0, 1, 1], [], []>} : vector<8x128xf32>, vector<128x128xf32>, vector<8x128xf32> -> vector<8x128xf32>
    %c0_3 = arith.constant 0 : index
    %c0_4 = arith.constant 0 : index
    %8 = vector.load %arg3[%c0_3, %c0_4] : memref<8x128xf32, #tpu.memory_space<vmem>>, vector<8x128xf32>
    tpu.vector_store %arg3[%c0_3, %c0_4], %7 {strides = array<i32>} : memref<8x128xf32, #tpu.memory_space<vmem>>, vector<8x128xf32>,
    return
  }
  func.func @transform_0(%arg0: i32) -> (i32, i32) {
    %c0_i32 = arith.constant 0 : i32
    %c0_i32_0 = arith.constant 0 : i32
    return %arg0, %c0_i32 : i32, i32
  }
  func.func @transform_1(%arg0: i32) -> (i32, i32) {
    %c0_i32 = arith.constant 0 : i32
    %c0_i32_0 = arith.constant 0 : i32
    %c0_i32_1 = arith.constant 0 : i32
    return %c0_i32, %c0_i32_0 : i32, i32
  }
  func.func @transform_2(%arg0: i32) -> (i32, i32) {
    %c0_i32 = arith.constant 0 : i32
    %c0_i32_0 = arith.constant 0 : i32
    return %arg0, %c0_i32 : i32, i32
  }
}

</mosaic_0001>

<bundles_post_ra>
// kernel: tpu_custom_call.1
= control target key start
LH: loop header
LB: loop body
LE: loop exit
PB: predicated region body
PF: predicated region fallthrough
CT: control target
= control target key end

     0   :  { %7 = vsyncpa [#allocation3], 0  ;;  %s324_s0 = inlined_call_operand.vmem [shape: s32[8,1], index: 0, kind: input, shape index: {}]   ;;  %s325_s1 = inlined_call_operand.hbm [shape: f32[128,128], index: 1, kind: input, shape index: {}]   ;;  %s326_s2 = inlined_call_operand.hbm [shape: f32[8,128], index: 2, kind: output, shape index: {}]  }
   0x1   :  { %8 = vsyncpa [#allocation4], 0  ;;  %s273_s9 = smov [#allocation2]   ;;  %s225_s13 = scalar_lea.hbm %s325_s1, 2048 }
   0x2   :  { %s16_s10 = sshll.u32 %s273_s9, 4  ;;  %p226_p0 = scmp.ne.s32.totalorder %s325_s1, %s225_s13  ;;  %s17_s10 = int_to_ptr.vmem [resolvable:$true] %s16_s10 }
   0x3   :  { %p229_p1 = scmp.lt.u32.totalorder %s225_s13, %s325_s1 }
   0x5   :  { %p231_p2 = pnand %p229_p1, %p226_p0 }
   0x7   :  { %234 = shalt.err (!%p231_p2)
}
   0x8   :  { %s235_s18 = scalar_lea.vmem %s17_s10, 2048  ;;  %p240_p4 = scmp.lt.s32.totalorder %s17_s10, %s17_s10 }
   0x9   :  { %p236_p3 = scmp.ne.s32.totalorder %s17_s10, %s235_s18  ;;  %p241_p5 = scmp.lt.s32.totalorder %s235_s18, %s235_s18 }
   0xb   :  { %p242_p6 = por %p241_p5, %p240_p4 }
   0xd   :  { %p243_p7 = pnand %p242_p6, %p236_p3 }
   0xf   :  { %246 = shalt.err (!%p243_p7)
}
  0x10   :  { %s274_s19 = smov 128   ;;  %s275_s20 = smov 8  }
  0x11   :  { %22 = dma.hbm_to_vmem [thread:$0]  %s325_s1, 2048, %s17_s10, [#allocation3], %s274_s19, %s274_s19, %s275_s20  }
  0x12   :  { %269 = dma.done.wait [#allocation3], 2048  }
  0x13   :  { %270 = vsyncadd [#allocation3], 4294965248  ;;  %v276_v0 = vmov 0   ;;  %v277_v1 = vmov 0.0|0.0   ;;  %v26_v2 = vld [vmem:[%s324_s0] sm:$0xff]  ;;  %v36_v4 = vld [vmem:[#allocation2 + $0x8] sm:$0xff]  ;;  %v27_v28 = vlaneseq }
  0x14   :  { %224 = vset.pattern.permute.xlu0 %v276_v0  ;;  %191 = vmatprep.subr.bf16.mxu0 %v277_v1  ;;  %v35_v3 = vld [vmem:[#allocation2] sm:$0xff]  ;;  %v37_v6 = vld [vmem:[#allocation2 + $0x10] sm:$0xff]  ;;  %v38_v7 = vld [vmem:[#allocation2 + $0x18] sm:$0xff]  ;;  %vm278_vm0 = vmmov 0   ;;  %v279_v8 = vmov 0.0   ;;  %v280_v31 = vmov 1.0  }
  0x15   :  { %30 = vperm.xlu0 %224, %v26_v2   ;;  %v192_v5 = vpack.c.bf16 %v36_v4, %v35_v3  ;;  %188 = vmatprep.mubr.msk.f32.mxu0 %vm278_vm0, %v279_v8  ;;  %v195_v9 = vpack.c.bf16 %v38_v7, %v37_v6  ;;  %v39_v10 = vld [vmem:[#allocation2 + $0x20] sm:$0xff]  ;;  %v40_v11 = vld [vmem:[#allocation2 + $0x28] sm:$0xff]  ;;  %v41_v13 = vld [vmem:[#allocation2 + $0x30] sm:$0xff]  ;;  %v28_v29 = vand.u32 127, %v27_v28  ;;  %s281_s0 = smov [#allocation5]  }
  0x16   :  { %v198_v12 = vpack.c.bf16 %v40_v11, %v39_v10  ;;  %v42_v14 = vld [vmem:[#allocation2 + $0x38] sm:$0xff]  ;;  %v43_v16 = vld [vmem:[#allocation2 + $0x40] sm:$0xff]  ;;  %v44_v17 = vld [vmem:[#allocation2 + $0x48] sm:$0xff]  ;;  %s128_s1 = sshll.u32 %s281_s0, 4  ;;  %s129_s1 = int_to_ptr.vmem [resolvable:$true] %s128_s1 }
  0x17   :  { %193 = vmatpush3.bf16.msra.mxu0 %v192_v5  ;;  %v201_v15 = vpack.c.bf16 %v42_v14, %v41_v13  ;;  %v204_v18 = vpack.c.bf16 %v44_v17, %v43_v16  ;;  %v45_v19 = vld [vmem:[#allocation2 + $0x50] sm:$0xff]  ;;  %v46_v20 = vld [vmem:[#allocation2 + $0x58] sm:$0xff]  ;;  %v47_v22 = vld [vmem:[#allocation2 + $0x60] sm:$0xff]  ;;  %s247_s25 = scalar_lea.vmem %s129_s1, 128  ;;  %p252_p9 = scmp.lt.s32.totalorder %s129_s1, %s129_s1 }
  0x18   :  { %194 = vmatprep.subr.bf16.mxu0 %v277_v1  ;;  %v207_v21 = vpack.c.bf16 %v46_v20, %v45_v19  ;;  %v48_v23 = vld [vmem:[#allocation2 + $0x68] sm:$0xff]  ;;  %v49_v25 = vld [vmem:[#allocation2 + $0x70] sm:$0xff]  ;;  %v50_v26 = vld [vmem:[#allocation2 + $0x78] sm:$0xff]  ;;  %p248_p8 = scmp.ne.s32.totalorder %s129_s1, %s247_s25  ;;  %p253_p10 = scmp.lt.s32.totalorder %s247_s25, %s247_s25 }
  0x19   :  { %v210_v24 = vpack.c.bf16 %v48_v23, %v47_v22  ;;  %v213_v27 = vpack.c.bf16 %v50_v26, %v49_v25 }
  0x1a   :  { %p254_p11 = por %p253_p10, %p252_p9 }
  0x1b   :  { %196 = vmatpush3.bf16.msra.mxu0 %v195_v9 }
  0x1c   :  { %197 = vmatprep.subr.bf16.mxu0 %v277_v1  ;;  %p255_p12 = pnand %p254_p11, %p248_p8 }
  0x1f   :  { %199 = vmatpush3.bf16.msra.mxu0 %v198_v12 }
  0x20   :  { %200 = vmatprep.subr.bf16.mxu0 %v277_v1 }
  0x23   :  { %202 = vmatpush3.bf16.msra.mxu0 %v201_v15 }
  0x24   :  { %203 = vmatprep.subr.bf16.mxu0 %v277_v1 }
  0x27   :  { %205 = vmatpush3.bf16.msra.mxu0 %v204_v18 }
  0x28   :  { %206 = vmatprep.subr.bf16.mxu0 %v277_v1 }
  0x2b   :  { %208 = vmatpush3.bf16.msra.mxu0 %v207_v21 }
  0x2c   :  { %209 = vmatprep.subr.bf16.mxu0 %v277_v1 }
  0x2f   :  { %211 = vmatpush3.bf16.msra.mxu0 %v210_v24 }
  0x30   :  { %212 = vmatprep.subr.bf16.mxu0 %v277_v1 }
  0x33   :  { %214 = vmatpush3.bf16.msra.mxu0 %v213_v27 }
  0x94   :  { %v31_v30 = vpop.permute.xlu0 %30 }
  0x95   :  { %vm32_vm1 = vcmp.eq.s32.totalorder %v28_v29, %v31_v30 }
  0x96   :  { %189 = vmatmul.mubr.msk.f32.vlgmr.msra.gmra.mrb[0].mxu0 %vm32_vm1, %v280_v31 }
 0x169   :  { %v117_v32 = vpop.f32.mrb[0].mxu0 }
 0x16a   :  { %121 = vst [vmem:[#allocation5] sm:$0xff] %v117_v32  ;;  %v190_v33 = vpop.f32.mrb[1].mxu0 }
 0x16b   :  { %258 = shalt.err (!%p255_p12)
}
 0x16c   :  { %s259_s28 = scalar_lea.hbm %s326_s2, 128 }
 0x16d   :  { %p260_p13 = scmp.ne.s32.totalorder %s326_s2, %s259_s28  ;;  %p263_p0 = scmp.lt.u32.totalorder %s259_s28, %s326_s2 }
 0x16f   :  { %p265_p1 = pnand %p263_p0, %p260_p13 }
 0x171   :  { %268 = shalt.err (!%p265_p1)
}
 0x172   :  { %131 = dma.vmem_to_hbm [thread:$0]  %s129_s1, 128, %s326_s2, [#allocation4]  }
 0x173   :  { %271 = dma.done.wait [#allocation4], 128  }
 0x174   :  { %272 = vsyncadd [#allocation4], 4294967168 }
 0x175   :  { %135 = vsyncpa [#allocation3], 1 }
 0x176   :  { %136 = vsyncpa [#allocation4], 1 }

</bundles_post_ra>
